<compile_context>
chip_gen: v5e
topology: v5e:2x2
jax: 0.10.0
libtpu: 0.0.40
codegen_flags: <defaults>
</compile_context>

<pallas_src>
import jax
import jax.numpy as jnp
from jax.experimental import pallas as pl
from jax.experimental.pallas import tpu as pltpu


def _round_up(v, m):
    return (v + m - 1) // m * m


def _pad2d(a, rows, cols):
    return jnp.pad(a, ((0, rows - a.shape[0]), (0, cols - a.shape[1])))


def mlp_kernel(x_ref, w0_ref, b0_ref, w1_ref, b1_ref, w2_ref, b2_ref,
               o_ref, h_ref):
    # Layer 0: Linear (bf16 MXU, f32 accumulate) + bias + ReLU in f32.
    h = jnp.dot(x_ref[...], w0_ref[...], preferred_element_type=jnp.float32)
    h = jnp.maximum(h + b0_ref[...], 0.0)
    h_ref[...] = h.astype(h_ref.dtype)          # stage bf16 intermediate in VMEM

    # Layer 1: Linear + bias + ReLU.
    h = jnp.dot(h_ref[...], w1_ref[...], preferred_element_type=jnp.float32)
    h = jnp.maximum(h + b1_ref[...], 0.0)
    h_ref[...] = h.astype(h_ref.dtype)

    # Layer 2: Linear (no activation, matches PyTorch forward).
    o = jnp.dot(h_ref[...], w2_ref[...], preferred_element_type=jnp.float32)
    o_ref[...] = (o + b2_ref[...]).astype(o_ref.dtype)


def mlp_forward(x, params):
    """x: (B, C_e, T, W); params: list of (W_t, b) with W_t = (in, out), b = (1, out)."""
    B, C_e, T, W = x.shape
    M = B * C_e
    K = T * W
    (w0, b0), (w1, b1), (w2, b2) = params
    H = w0.shape[1]
    N = w2.shape[1]

    # Lane-dense / MXU-friendly padded feature dims.
    K_pad = _round_up(K, 128)
    H_pad = _round_up(H, 128)
    N_pad = _round_up(N, 128)

    # Row tiling: TM multiple of 8, sized well under the v7x 64 MiB VMEM budget.
    M_pad8 = _round_up(M, 8)
    TM = min(512, M_pad8)
    M_pad = _round_up(M, TM)
    grid = (M_pad // TM,)

    # Pad + cast inputs / weights to bf16 (biases stay f32, elementwise math in f32).
    x2d = _pad2d(x.reshape(M, K), M_pad, K_pad).astype(jnp.bfloat16)
    w0p = _pad2d(w0, K_pad, H_pad).astype(jnp.bfloat16)
    w1p = _pad2d(w1, H_pad, H_pad).astype(jnp.bfloat16)
    w2p = _pad2d(w2, H_pad, N_pad).astype(jnp.bfloat16)
    b0p = _pad2d(b0, 1, H_pad).astype(jnp.float32)
    b1p = _pad2d(b1, 1, H_pad).astype(jnp.float32)
    b2p = _pad2d(b2, 1, N_pad).astype(jnp.float32)

    # VMEM budget: double-buffered x/out tiles + resident weights/biases + scratch,
    # 2x headroom; capped at v7x's 64 MiB, floored at the 32 MiB scoped default.
    est = (2 * (TM * K_pad * 2 + TM * N_pad * 4)
           + 2 * ((K_pad * H_pad + H_pad * H_pad + H_pad * N_pad) * 2
                  + (2 * H_pad + N_pad) * 4)
           + TM * H_pad * 2)
    vmem_limit = min(64 * 1024 * 1024, max(32 * 1024 * 1024, 2 * est + (2 << 20)))

    cost = pl.CostEstimate(
        flops=2 * M_pad * (K_pad * H_pad + H_pad * H_pad + H_pad * N_pad),
        transcendentals=0,
        bytes_accessed=(x2d.size * 2 + w0p.size * 2 + w1p.size * 2 + w2p.size * 2
                        + (b0p.size + b1p.size + b2p.size) * 4
                        + M_pad * N_pad * 4),
    )

    resident = lambda i: (0, 0)   # weights/biases stay put across row tiles

    out = pl.pallas_call(
        mlp_kernel,
        out_shape=jax.ShapeDtypeStruct((M_pad, N_pad), jnp.float32),
        grid_spec=pltpu.PrefetchScalarGridSpec(
            num_scalar_prefetch=0,
            grid=grid,
            in_specs=[
                pl.BlockSpec((TM, K_pad), lambda i: (i, 0)),
                pl.BlockSpec((K_pad, H_pad), resident),
                pl.BlockSpec((1, H_pad), resident),
                pl.BlockSpec((H_pad, H_pad), resident),
                pl.BlockSpec((1, H_pad), resident),
                pl.BlockSpec((H_pad, N_pad), resident),
                pl.BlockSpec((1, N_pad), resident),
            ],
            out_specs=pl.BlockSpec((TM, N_pad), lambda i: (i, 0)),
            scratch_shapes=[pltpu.VMEM((TM, H_pad), jnp.bfloat16)],
        ),
        compiler_params=pltpu.CompilerParams(
            dimension_semantics=("parallel",),
            vmem_limit_bytes=int(vmem_limit),
        ),
        cost_estimate=cost,
    )(x2d, w0p, b0p, w1p, b1p, w2p, b2p)

    return out[:M, :N].reshape(B, C_e, N)


def init_mlp_params(key, input_dim, hidden_dim, output_dim, num_layers=3):
    """Deterministic init mimicking nn.Linear's default (uniform +/- 1/sqrt(fan_in)).

    Weights are stored already transposed: (in_features, out_features).
    Biases are stored as (1, out_features) for clean lane broadcasting.
    """
    h = [hidden_dim] * (num_layers - 1)
    dims = list(zip([input_dim] + h, h + [output_dim]))
    params = []
    for (n_in, n_out) in dims:
        key, kw, kb = jax.random.split(key, 3)
        bound = 1.0 / (n_in ** 0.5)
        w_t = jax.random.uniform(kw, (n_in, n_out), jnp.float32, -bound, bound)
        b = jax.random.uniform(kb, (1, n_out), jnp.float32, -bound, bound)
        params.append((w_t, b))
    return params


def mlp_reference(x, params):
    """Pure-JAX reference using the same precision pipeline as the kernel:
    bf16 operands into the matmul, f32 accumulation, f32 bias/ReLU."""
    B, C_e, T, W = x.shape
    h = x.reshape(B, C_e, T * W).astype(jnp.bfloat16)
    n = len(params)
    for i, (w_t, b) in enumerate(params):
        y = jnp.einsum("bcd,do->bco", h, w_t.astype(jnp.bfloat16),
                       preferred_element_type=jnp.float32) + b[0]
        if i < n - 1:
            h = jax.nn.relu(y).astype(jnp.bfloat16)
        else:
            h = y
    return h


if __name__ == "__main__":
    # Small shapes consistent with the module: input_dim = T*W
    B, C_e, T, W = 2, 4, 8, 4          # x: (2, 4, 8, 4)
    input_dim = T * W                   # 32
    hidden_dim = 32
    output_dim = 16
    num_layers = 3

    key = jax.random.PRNGKey(0)
    kx, kp = jax.random.split(key)
    x = jax.random.normal(kx, (B, C_e, T, W), dtype=jnp.float32)
    params = init_mlp_params(kp, input_dim, hidden_dim, output_dim, num_layers)

    out = mlp_forward(x, params)
    out = jax.block_until_ready(out)

    ref = mlp_reference(x, params)
    assert out.shape == (B, C_e, output_dim), out.shape
    assert jnp.allclose(out, ref, atol=1e-2, rtol=1e-2), "mismatch vs reference"

    print("KERNEL_OK")
</pallas_src>

<mosaic_0001>
module attributes {stable_mosaic.version = 11 : i64} {
  func.func @mlp_kernel(%arg0: i32, %arg1: memref<8x128xbf16, #tpu.memory_space<vmem>>, %arg2: memref<128x128xbf16, #tpu.memory_space<vmem>>, %arg3: memref<1x128xf32, #tpu.memory_space<vmem>>, %arg4: memref<128x128xbf16, #tpu.memory_space<vmem>>, %arg5: memref<1x128xf32, #tpu.memory_space<vmem>>, %arg6: memref<128x128xbf16, #tpu.memory_space<vmem>>, %arg7: memref<1x128xf32, #tpu.memory_space<vmem>>, %arg8: memref<8x128xf32, #tpu.memory_space<vmem>>, %arg9: memref<8x128xbf16, #tpu.memory_space<vmem>>) attributes {dimension_semantics = [#tpu.dimension_semantics<parallel>], iteration_bounds = array<i64: 1>, scalar_prefetch = 0 : i64, scratch_operands = 1 : i64, tpu.core_type = #tpu.core_type<tc>, window_params = [{transform_indices = @transform_0, window_bounds = array<i64: 8, 128>}, {pipeline_mode = #tpu.pipeline_mode<synchronous>, transform_indices = @transform_1, window_bounds = array<i64: 128, 128>}, {pipeline_mode = #tpu.pipeline_mode<synchronous>, transform_indices = @transform_2, window_bounds = array<i64: 1, 128>}, {pipeline_mode = #tpu.pipeline_mode<synchronous>, transform_indices = @transform_3, window_bounds = array<i64: 128, 128>}, {pipeline_mode = #tpu.pipeline_mode<synchronous>, transform_indices = @transform_4, window_bounds = array<i64: 1, 128>}, {pipeline_mode = #tpu.pipeline_mode<synchronous>, transform_indices = @transform_5, window_bounds = array<i64: 128, 128>}, {pipeline_mode = #tpu.pipeline_mode<synchronous>, transform_indices = @transform_6, window_bounds = array<i64: 1, 128>}, {transform_indices = @transform_7, window_bounds = array<i64: 8, 128>}]} {
    %c0 = arith.constant 0 : index
    %c0_0 = arith.constant 0 : index
    %0 = vector.load %arg1[%c0, %c0_0] : memref<8x128xbf16, #tpu.memory_space<vmem>>, vector<8x128xbf16>
    %c0_1 = arith.constant 0 : index
    %c0_2 = arith.constant 0 : index
    %1 = vector.load %arg2[%c0_1, %c0_2] : memref<128x128xbf16, #tpu.memory_space<vmem>>, vector<128x128xbf16>
    %cst = arith.constant dense<0.000000e+00> : vector<8x128xf32>
    %2 = tpu.matmul %0, %1, %cst {dimension_numbers = #tpu.dot_dimension_numbers<[1], [0], [0], [1], [0, 0, 1, 1], [], []>} : vector<8x128xbf16>, vector<128x128xbf16>, vector<8x128xf32> -> vector<8x128xf32>
    %c0_3 = arith.constant 0 : index
    %c0_4 = arith.constant 0 : index
    %3 = vector.load %arg3[%c0_3, %c0_4] : memref<1x128xf32, #tpu.memory_space<vmem>>, vector<1x128xf32>
    %4 = vector.broadcast %3 : vector<1x128xf32> to vector<8x128xf32>
    %5 = arith.addf %2, %4 : vector<8x128xf32>
    %cst_5 = arith.constant 0.000000e+00 : f32
    %6 = vector.broadcast %cst_5 : f32 to vector<8x128xf32>
    %7 = arith.maximumf %5, %6 : vector<8x128xf32>
    %8 = arith.truncf %7 : vector<8x128xf32> to vector<8x128xbf16>
    %c0_6 = arith.constant 0 : index
    %c0_7 = arith.constant 0 : index
    %9 = vector.load %arg9[%c0_6, %c0_7] : memref<8x128xbf16, #tpu.memory_space<vmem>>, vector<8x128xbf16>
    tpu.vector_store %arg9[%c0_6, %c0_7], %8 {strides = array<i32>} : memref<8x128xbf16, #tpu.memory_space<vmem>>, vector<8x128xbf16>,
    %c0_8 = arith.constant 0 : index
    %c0_9 = arith.constant 0 : index
    %10 = vector.load %arg9[%c0_8, %c0_9] : memref<8x128xbf16, #tpu.memory_space<vmem>>, vector<8x128xbf16>
    %c0_10 = arith.constant 0 : index
    %c0_11 = arith.constant 0 : index
    %11 = vector.load %arg4[%c0_10, %c0_11] : memref<128x128xbf16, #tpu.memory_space<vmem>>, vector<128x128xbf16>
    %cst_12 = arith.constant dense<0.000000e+00> : vector<8x128xf32>
    %12 = tpu.matmul %10, %11, %cst_12 {dimension_numbers = #tpu.dot_dimension_numbers<[1], [0], [0], [1], [0, 0, 1, 1], [], []>} : vector<8x128xbf16>, vector<128x128xbf16>, vector<8x128xf32> -> vector<8x128xf32>
    %c0_13 = arith.constant 0 : index
    %c0_14 = arith.constant 0 : index
    %13 = vector.load %arg5[%c0_13, %c0_14] : memref<1x128xf32, #tpu.memory_space<vmem>>, vector<1x128xf32>
    %14 = vector.broadcast %13 : vector<1x128xf32> to vector<8x128xf32>
    %15 = arith.addf %12, %14 : vector<8x128xf32>
    %cst_15 = arith.constant 0.000000e+00 : f32
    %16 = vector.broadcast %cst_15 : f32 to vector<8x128xf32>
    %17 = arith.maximumf %15, %16 : vector<8x128xf32>
    %18 = arith.truncf %17 : vector<8x128xf32> to vector<8x128xbf16>
    %c0_16 = arith.constant 0 : index
    %c0_17 = arith.constant 0 : index
    %19 = vector.load %arg9[%c0_16, %c0_17] : memref<8x128xbf16, #tpu.memory_space<vmem>>, vector<8x128xbf16>
    tpu.vector_store %arg9[%c0_16, %c0_17], %18 {strides = array<i32>} : memref<8x128xbf16, #tpu.memory_space<vmem>>, vector<8x128xbf16>,
    %c0_18 = arith.constant 0 : index
    %c0_19 = arith.constant 0 : index
    %20 = vector.load %arg9[%c0_18, %c0_19] : memref<8x128xbf16, #tpu.memory_space<vmem>>, vector<8x128xbf16>
    %c0_20 = arith.constant 0 : index
    %c0_21 = arith.constant 0 : index
    %21 = vector.load %arg6[%c0_20, %c0_21] : memref<128x128xbf16, #tpu.memory_space<vmem>>, vector<128x128xbf16>
    %cst_22 = arith.constant dense<0.000000e+00> : vector<8x128xf32>
    %22 = tpu.matmul %20, %21, %cst_22 {dimension_numbers = #tpu.dot_dimension_numbers<[1], [0], [0], [1], [0, 0, 1, 1], [], []>} : vector<8x128xbf16>, vector<128x128xbf16>, vector<8x128xf32> -> vector<8x128xf32>
    %c0_23 = arith.constant 0 : index
    %c0_24 = arith.constant 0 : index
    %23 = vector.load %arg7[%c0_23, %c0_24] : memref<1x128xf32, #tpu.memory_space<vmem>>, vector<1x128xf32>
    %24 = vector.broadcast %23 : vector<1x128xf32> to vector<8x128xf32>
    %25 = arith.addf %22, %24 : vector<8x128xf32>
    %c0_25 = arith.constant 0 : index
    %c0_26 = arith.constant 0 : index
    %26 = vector.load %arg8[%c0_25, %c0_26] : memref<8x128xf32, #tpu.memory_space<vmem>>, vector<8x128xf32>
    tpu.vector_store %arg8[%c0_25, %c0_26], %25 {strides = array<i32>} : memref<8x128xf32, #tpu.memory_space<vmem>>, vector<8x128xf32>,
    return
  }
  func.func @transform_0(%arg0: i32) -> (i32, i32) {
    %c0_i32 = arith.constant 0 : i32
    %c0_i32_0 = arith.constant 0 : i32
    return %arg0, %c0_i32 : i32, i32
  }
  func.func @transform_1(%arg0: i32) -> (i32, i32) {
    %c0_i32 = arith.constant 0 : i32
    %c0_i32_0 = arith.constant 0 : i32
    %c0_i32_1 = arith.constant 0 : i32
    return %c0_i32, %c0_i32_0 : i32, i32
  }
  func.func @transform_2(%arg0: i32) -> (i32, i32) {
    %c0_i32 = arith.constant 0 : i32
    %c0_i32_0 = arith.constant 0 : i32
    %c0_i32_1 = arith.constant 0 : i32
    return %c0_i32, %c0_i32_0 : i32, i32
  }
  func.func @transform_3(%arg0: i32) -> (i32, i32) {
    %c0_i32 = arith.constant 0 : i32
    %c0_i32_0 = arith.constant 0 : i32
    %c0_i32_1 = arith.constant 0 : i32
    return %c0_i32, %c0_i32_0 : i32, i32
  }
  func.func @transform_4(%arg0: i32) -> (i32, i32) {
    %c0_i32 = arith.constant 0 : i32
    %c0_i32_0 = arith.constant 0 : i32
    %c0_i32_1 = arith.constant 0 : i32
    return %c0_i32, %c0_i32_0 : i32, i32
  }
  func.func @transform_5(%arg0: i32) -> (i32, i32) {
    %c0_i32 = arith.constant 0 : i32
    %c0_i32_0 = arith.constant 0 : i32
    %c0_i32_1 = arith.constant 0 : i32
    return %c0_i32, %c0_i32_0 : i32, i32
  }
  func.func @transform_6(%arg0: i32) -> (i32, i32) {
    %c0_i32 = arith.constant 0 : i32
    %c0_i32_0 = arith.constant 0 : i32
    %c0_i32_1 = arith.constant 0 : i32
    return %c0_i32, %c0_i32_0 : i32, i32
  }
  func.func @transform_7(%arg0: i32) -> (i32, i32) {
    %c0_i32 = arith.constant 0 : i32
    %c0_i32_0 = arith.constant 0 : i32
    return %arg0, %c0_i32 : i32, i32
  }
}

</mosaic_0001>

<bundles_post_ra>
// kernel: tpu_custom_call.1
= control target key start
LH: loop header
LB: loop body
LE: loop exit
PB: predicated region body
PF: predicated region fallthrough
CT: control target
= control target key end

     0   :  { %12 = vsyncpa [#allocation4], 0  ;;  %s689_s0 = inlined_call_operand.hbm [shape: bf16[8,128], index: 0, kind: input, shape index: {}]   ;;  %s690_s1 = inlined_call_operand.hbm [shape: bf16[128,128], index: 1, kind: input, shape index: {}]   ;;  %s691_s2 = inlined_call_operand.vmem [shape: f32[1,128], index: 2, kind: input, shape index: {}]   ;;  %s692_s3 = inlined_call_operand.hbm [shape: bf16[128,128], index: 3, kind: input, shape index: {}]   ;;  %s693_s4 = inlined_call_operand.vmem [shape: f32[1,128], index: 4, kind: input, shape index: {}]   ;;  %s694_s5 = inlined_call_operand.hbm [shape: bf16[128,128], index: 5, kind: input, shape index: {}]   ;;  %s695_s6 = inlined_call_operand.vmem [shape: f32[1,128], index: 6, kind: input, shape index: {}]   ;;  %s696_s7 = inlined_call_operand.hbm [shape: f32[8,128], index: 7, kind: output, shape index: {}]  }
   0x1   :  { %13 = vsyncpa [#allocation7], 0 }
   0x2   :  { %14 = vsyncpa [#allocation10], 0  ;;  %s31_s26 = sshll.u32 %s690_s1, 4  ;;  %s32_s26 = int_to_ptr.hbm [resolvable:$true] %s31_s26 }
   0x3   :  { %15 = vsyncpa [#allocation5], 0  ;;  %s618_s27 = smov [#allocation6]   ;;  %s21_s8 = sshll.u32 %s689_s0, 4  ;;  %s22_s8 = int_to_ptr.hbm [resolvable:$true] %s21_s8 }
   0x4   :  { %s33_s28 = sshll.u32 %s618_s27, 4  ;;  %s619_s9 = smov 64   ;;  %s34_s28 = int_to_ptr.vmem [resolvable:$true] %s33_s28 }
   0x5   :  { %s620_s10 = smov 4   ;;  %s621_s11 = smov [#allocation3]  }
   0x6   :  { %39 = dma.hbm_to_vmem [thread:$0]  %s32_s26, 1024, %s34_s28, [#allocation7], %s619_s9, %s619_s9, %s620_s10  }
   0x7   :  { %s23_s12 = sshll.u32 %s621_s11, 4  ;;  %s46_s15 = sshll.u32 %s692_s3, 4  ;;  %s24_s12 = int_to_ptr.vmem [resolvable:$true] %s23_s12  ;;  %s47_s15 = int_to_ptr.hbm [resolvable:$true] %s46_s15 }
   0x8   :  { %26 = dma.hbm_to_vmem [thread:$0]  %s22_s8, 64, %s24_s12, [#allocation4]  }
   0x9   :  { %s61_s17 = sshll.u32 %s694_s5, 4  ;;  %s622_s18 = smov [#allocation8]   ;;  %s62_s17 = int_to_ptr.hbm [resolvable:$true] %s61_s17 }
   0xa   :  { %s48_s19 = sshll.u32 %s622_s18, 4  ;;  %s623_s0 = smov [#allocation9]   ;;  %s49_s19 = int_to_ptr.vmem [resolvable:$true] %s48_s19 }
   0xb   :  { %54 = dma.hbm_to_vmem [thread:$0]  %s47_s15, 1024, %s49_s19, [#allocation7], %s619_s9, %s619_s9, %s620_s10  }
   0xc   :  { %s63_s20 = sshll.u32 %s623_s0, 4  ;;  %s64_s20 = int_to_ptr.vmem [resolvable:$true] %s63_s20 }
   0xd   :  { %69 = dma.hbm_to_vmem [thread:$0]  %s62_s17, 1024, %s64_s20, [#allocation10], %s619_s9, %s619_s9, %s620_s10  }
   0xe   :  { %610 = dma.done.wait [#allocation4], 64  }
   0xf   :  { %611 = vsyncadd [#allocation4], 4294967232 }
  0x10   :  { %612 = dma.done.wait [#allocation7], 2048  }
  0x11   :  { %613 = vsyncadd [#allocation7], 4294965248 }
  0x12   :  { %614 = dma.done.wait [#allocation10], 1024  }
  0x13   :  { %615 = vsyncadd [#allocation10], 4294966272  ;;  %v463_v0 = vld [vmem:[#allocation6 + $0x38] sm:$0xff]  ;;  %v462_v1 = vld [vmem:[#allocation6 + $0x30] sm:$0xff]  ;;  %s624_s24 = smov [#allocation11]   ;;  %s348_s28 = sshll.u32 %s696_s7, 4  ;;  %s349_s28 = int_to_ptr.hbm [resolvable:$true] %s348_s28 }
  0x14   :  { %157 = vmatpush.bf16.msra.mxu0 %v463_v0  ;;  %v471_v2 = vld [vmem:[#allocation8 + $0x38] sm:$0xff]  ;;  %v470_v3 = vld [vmem:[#allocation8 + $0x30] sm:$0xff]  ;;  %v461_v4 = vld [vmem:[#allocation6 + $0x28] sm:$0xff]  ;;  %s346_s25 = sshll.u32 %s624_s24, 4  ;;  %s347_s25 = int_to_ptr.vmem [resolvable:$true] %s346_s25 }
  0x15   :  { %242 = vmatpush.bf16.msra.mxu1 %v471_v2  ;;  %v469_v5 = vld [vmem:[#allocation8 + $0x28] sm:$0xff]  ;;  %v460_v6 = vld [vmem:[#allocation6 + $0x20] sm:$0xff]  ;;  %v459_v8 = vld [vmem:[#allocation6 + $0x18] sm:$0xff] }
  0x16   :  { %v468_v7 = vld [vmem:[#allocation8 + $0x20] sm:$0xff]  ;;  %v458_v9 = vld [vmem:[#allocation6 + $0x10] sm:$0xff]  ;;  %v457_v10 = vld [vmem:[#allocation6 + $0x8] sm:$0xff] }
  0x17   :  { %v456_v11 = vld [vmem:[#allocation6] sm:$0xff]  ;;  %v88_v12 = vld [vmem:[#allocation3] sm:$0xf]  ;;  %v466_v14 = vld [vmem:[#allocation8 + $0x10] sm:$0xff] }
  0x18   :  { %158 = vmatpush.bf16.msra.mxu0 %v462_v1  ;;  %v467_v13 = vld [vmem:[#allocation8 + $0x18] sm:$0xff]  ;;  %v465_v15 = vld [vmem:[#allocation8 + $0x8] sm:$0xff]  ;;  %v464_v16 = vld [vmem:[#allocation8] sm:$0xff] }
  0x19   :  { %243 = vmatpush.bf16.msra.mxu1 %v470_v3  ;;  %v479_v17 = vld [vmem:[#allocation9 + $0x38] sm:$0xff]  ;;  %v478_v18 = vld [vmem:[#allocation9 + $0x30] sm:$0xff]  ;;  %v477_v19 = vld [vmem:[#allocation9 + $0x28] sm:$0xff] }
  0x1a   :  { %327 = vmatpush.bf16.msra.mxu2 %v479_v17  ;;  %v476_v20 = vld [vmem:[#allocation9 + $0x20] sm:$0xff]  ;;  %v487_v21 = vld [vmem:[%s691_s2] ss:$0 sm:$0xff]  ;;  %v474_v29 = vld [vmem:[#allocation9 + $0x10] sm:$0xff] }
  0x1b   :  { %v475_v28 = vld [vmem:[#allocation9 + $0x18] sm:$0xff]  ;;  %v473_v30 = vld [vmem:[#allocation9 + $0x8] sm:$0xff]  ;;  %v472_v31 = vld [vmem:[#allocation9] sm:$0xff] }
  0x1c   :  { %159 = vmatpush.bf16.msra.mxu0 %v461_v4  ;;  %v488_v32 = vld [vmem:[%s693_s4] ss:$0 sm:$0xff] }
  0x1d   :  { %244 = vmatpush.bf16.msra.mxu1 %v469_v5  ;;  %v489_v39 = vld [vmem:[%s695_s6] ss:$0 sm:$0xff] }
  0x1e   :  { %328 = vmatpush.bf16.msra.mxu2 %v478_v18 }
  0x20   :  { %160 = vmatpush.bf16.msra.mxu0 %v460_v6 }
  0x21   :  { %245 = vmatpush.bf16.msra.mxu1 %v468_v7 }
  0x22   :  { %329 = vmatpush.bf16.msra.mxu2 %v477_v19 }
  0x24   :  { %161 = vmatpush.bf16.msra.mxu0 %v459_v8 }
  0x25   :  { %246 = vmatpush.bf16.msra.mxu1 %v467_v13 }
  0x26   :  { %330 = vmatpush.bf16.msra.mxu2 %v476_v20 }
  0x28   :  { %162 = vmatpush.bf16.msra.mxu0 %v458_v9 }
  0x29   :  { %247 = vmatpush.bf16.msra.mxu1 %v466_v14 }
  0x2a   :  { %331 = vmatpush.bf16.msra.mxu2 %v475_v28 }
  0x2c   :  { %163 = vmatpush.bf16.msra.mxu0 %v457_v10 }
  0x2d   :  { %248 = vmatpush.bf16.msra.mxu1 %v465_v15 }
  0x2e   :  { %332 = vmatpush.bf16.msra.mxu2 %v474_v29 }
  0x30   :  { %164 = vmatpush.bf16.msra.mxu0 %v456_v11 }
  0x31   :  { %249 = vmatpush.bf16.msra.mxu1 %v464_v16 }
  0x32   :  { %333 = vmatpush.bf16.msra.mxu2 %v473_v30 }
  0x33   :  { %165 = vmatmul.bf16.vlgmr.msra.gmra.mxu0 %v88_v12 }
  0x36   :  { %334 = vmatpush.bf16.msra.mxu2 %v472_v31 }
  0xb0   :  { %v166_v22 = vpop.f32.mrf.mxu0 }
  0xb1   :  { %v167_v23 = vadd.f32 %v487_v21, %v166_v22 }
  0xb3   :  { %v170_v24 = vmax.f32 %v167_v23, 0.0 }
  0xb5   :  { %v171_v25 = vpack.c.bf16 %v170_v24, %v170_v24 }
  0xb7   :  { %172 = vst [vmem:[#allocation2] sm:$0xf] %v171_v25 }
  0xb8   :  { %v168_v26 = vpop.f32.mrf.mxu0 }
  0xbe   :  { %v173_v27 = vld [vmem:[#allocation2] sm:$0xf] }
  0xbf   :  { %250 = vmatmul.bf16.vlgmr.msra.gmra.mxu1 %v173_v27 }
 0x13c   :  { %v251_v33 = vpop.f32.mrf.mxu1 }
 0x13d   :  { %v252_v34 = vadd.f32 %v488_v32, %v251_v33 }
 0x13f   :  { %v255_v35 = vmax.f32 %v252_v34, 0.0 }
 0x141   :  { %v256_v36 = vpack.c.bf16 %v255_v35, %v255_v35 }
 0x143   :  { %257 = vst [vmem:[#allocation2] sm:$0xf] %v256_v36 }
 0x144   :  { %v253_v37 = vpop.f32.mrf.mxu1 }
 0x14a   :  { %v258_v38 = vld [vmem:[#allocation2] sm:$0xf] }
 0x14b   :  { %335 = vmatmul.bf16.vlgmr.msra.gmra.mxu2 %v258_v38 }
 0x1ce   :  { %v336_v40 = vpop.f32.mrf.mxu2 }
 0x1cf   :  { %v337_v41 = vadd.f32 %v489_v39, %v336_v40 }
 0x1d1   :  { %340 = vst [vmem:[#allocation11] sm:$0xff] %v337_v41 }
 0x1d2   :  { %351 = dma.vmem_to_hbm [thread:$0]  %s347_s25, 128, %s349_s28, [#allocation5]  }
 0x1d6   :  { %v338_v42 = vpop.f32.mrf.mxu2 }
 0x1d7   :  { %616 = dma.done.wait [#allocation5], 128  }
 0x1d8   :  { %617 = vsyncadd [#allocation5], 4294967168 }
 0x1d9   :  { %356 = vsyncpa [#allocation4], 1 }
 0x1da   :  { %357 = vsyncpa [#allocation7], 1 }
 0x1db   :  { %358 = vsyncpa [#allocation10], 1 }
 0x1dc   :  { %359 = vsyncpa [#allocation5], 1 }

</bundles_post_ra>
